<compile_context>
chip_gen: v6e
topology: v6e:2x2x1
jax: 0.10.0
libtpu: 0.0.40
codegen_flags: <defaults>
</compile_context>

<pallas_src>
import functools
import math

import jax
import jax.numpy as jnp
from jax.experimental import pallas as pl
from jax.experimental.pallas import tpu as pltpu


# ---------------------------------------------------------------------------
# Interpolation matrices (match PyTorch align_corners=False conventions)
# ---------------------------------------------------------------------------
def _bilinear_matrix(out_size: int, in_size: int, scale: float) -> jnp.ndarray:
    """M (out_size, in_size): y = M @ x is a 1-D bilinear resize with the
    half-pixel convention used by F.upsample/interpolate(mode='bilinear')."""
    dst = jnp.arange(out_size, dtype=jnp.float32)
    src = (dst + 0.5) / scale - 0.5
    src = jnp.maximum(src, 0.0)                      # PyTorch clamps negative coords
    i0 = jnp.floor(src).astype(jnp.int32)
    i0 = jnp.minimum(i0, in_size - 1)
    i1 = jnp.minimum(i0 + 1, in_size - 1)
    w1 = src - i0.astype(jnp.float32)
    w0 = 1.0 - w1
    cols = jnp.arange(in_size, dtype=jnp.int32)
    m = (w0[:, None] * (cols[None, :] == i0[:, None]).astype(jnp.float32)
         + w1[:, None] * (cols[None, :] == i1[:, None]).astype(jnp.float32))
    return m


def _output_geometry(h_in, w_in, scale_factor, size):
    if size is not None:
        h_out, w_out = int(size[0]), int(size[1])
        scale_h = h_out / h_in
        scale_w = w_out / w_in
    else:
        scale_h = scale_w = float(scale_factor)
        # PyTorch: output_size = floor(input_size * scale_factor)
        h_out = int(math.floor(h_in * scale_h))
        w_out = int(math.floor(w_in * scale_w))
    return h_out, w_out, scale_h, scale_w


# ---------------------------------------------------------------------------
# Tiling / VMEM budgeting
# ---------------------------------------------------------------------------
def _round_up(v, m):
    return ((v + m - 1) // m) * m


def _padded_bytes(rows, cols, itemsize):
    """f32/bf16 VMEM footprint with (sublane, lane) = (8, 128) tile padding."""
    return _round_up(max(rows, 1), 8) * _round_up(max(cols, 1), 128) * itemsize


def _device_budgets():
    """(per-step block budget, vmem_limit_bytes, preferred min grid blocks)."""
    kind = ""
    try:
        kind = jax.devices()[0].device_kind.lower()
    except Exception:
        pass
    if "v5" in kind or "v6" in kind:
        # 128 MiB physical VMEM: afford large blocks, keep a few steps for overlap.
        return 56 * 1024 * 1024, 100 * 1024 * 1024, 4
    # v7x (64 MiB VMEM / TC, 2 TensorCores) and unknown parts: conservative,
    # and prefer >= 8 grid blocks so both cores still pipeline.
    return 20 * 1024 * 1024, 48 * 1024 * 1024, 8


def _pick_tiles(nc, h_in, w_in, h_out, w_out, in_itemsize, out_itemsize,
                budget, min_blocks):
    """Choose (tc, th): channel-group size and H_out tile.

    Preference order: (8,128)-friendly lane widths (tc*w_in and tc*w_out
    multiples of 128, or tc == nc so the block spans the full last dim),
    fits the padded VMEM budget, keeps >= min_blocks grid steps if possible,
    then largest tc (big DMAs, amortized per-step overhead).
    """
    def step_bytes(tc, th):
        x_b = 2 * _padded_bytes(h_in, tc * w_in, in_itemsize)         # double-buffered input
        a_b = 2 * _padded_bytes(th, h_in, 4)                           # A tile
        bd_b = 2 * _padded_bytes(tc * w_in, tc * w_out, 4)             # blockdiag(B^T)
        o_b = 2 * _padded_bytes(th, tc * w_out, out_itemsize)          # output block
        y_b = _padded_bytes(th, tc * w_in, 4)                          # f32 intermediate
        return x_b + a_b + bd_b + o_b + y_b

    divisors = [d for d in range(1, nc + 1) if nc % d == 0]
    lane_ok = [d for d in divisors
               if d == nc or ((d * w_in) % 128 == 0 and (d * w_out) % 128 == 0)]
    candidates = lane_ok if lane_ok else divisors

    fitting = [d for d in candidates if step_bytes(d, h_out) <= budget]
    if fitting:
        pref = [d for d in fitting if nc // d >= min_blocks]
        tc = max(pref) if pref else max(fitting)
        return tc, h_out

    # Single plane-group too large for the budget: shrink the channel group and
    # tile over H_out instead of over-committing VMEM.
    tc = min(divisors)
    th = h_out
    while step_bytes(tc, th) > budget and th > 8:
        th = max(8, _round_up(th // 2, 8))
    return tc, th


# ---------------------------------------------------------------------------
# Kernel
# ---------------------------------------------------------------------------
def _upsample_kernel(x_ref, a_ref, bd_ref, o_ref):
    # x_ref : (H_in, TC*W_in)         channel-major along lanes
    # a_ref : (TH,  H_in)             row-interp matrix tile
    # bd_ref: (TC*W_in, TC*W_out)     blockdiag of B^T (column interp, per channel)
    # o_ref : (TH,  TC*W_out)         lane-dense output block
    y = jnp.dot(a_ref[...], x_ref[...], preferred_element_type=jnp.float32)
    o_ref[...] = jnp.dot(y, bd_ref[...],
                         preferred_element_type=jnp.float32).astype(o_ref.dtype)


@functools.partial(jax.jit, static_argnames=("scale_factor", "size"))
def _bilinear_upsample_impl(x, scale_factor=None, size=None):
    n, c, h_in, w_in = x.shape
    h_out, w_out, scale_h, scale_w = _output_geometry(h_in, w_in, scale_factor, size)
    nc = n * c

    budget, vmem_limit, min_blocks = _device_budgets()
    tc, th = _pick_tiles(nc, h_in, w_in, h_out, w_out,
                         x.dtype.itemsize, x.dtype.itemsize, budget, min_blocks)

    # Host-side layout plumbing (one pass over the *input*, which is the small
    # tensor for an upsample): channels move into the lane axis so both kernel
    # matmuls are plain lane-dense 2-D GEMMs with no in-kernel relayouts.
    x_t = jnp.transpose(x.reshape(nc, h_in, w_in), (1, 0, 2)).reshape(h_in, nc * w_in)

    a = _bilinear_matrix(h_out, h_in, scale_h)                 # (H_out, H_in)
    bt = _bilinear_matrix(w_out, w_in, scale_w).T              # (W_in, W_out)
    bd = jnp.kron(jnp.eye(tc, dtype=jnp.float32), bt)          # (TC*W_in, TC*W_out)

    grid = (nc // tc, pl.cdiv(h_out, th))

    out2d = pl.pallas_call(
        _upsample_kernel,
        out_shape=jax.ShapeDtypeStruct((h_out, nc * w_out), x.dtype),
        grid_spec=pltpu.PrefetchScalarGridSpec(
            num_scalar_prefetch=0,
            grid=grid,
            in_specs=[
                pl.BlockSpec((h_in, tc * w_in), lambda i, j: (0, i)),
                pl.BlockSpec((th, h_in), lambda i, j: (j, 0)),
                pl.BlockSpec((tc * w_in, tc * w_out), lambda i, j: (0, 0)),
            ],
            out_specs=pl.BlockSpec((th, tc * w_out), lambda i, j: (j, i)),
        ),
        compiler_params=pltpu.CompilerParams(
            dimension_semantics=("parallel", "arbitrary"),
            vmem_limit_bytes=vmem_limit,
        ),
    )(x_t, a, bd)

    # Undo the lane-dense layout with one XLA transpose over the output.
    out = out2d.reshape(h_out, nc, w_out).transpose(1, 0, 2)
    return out.reshape(n, c, h_out, w_out)


def bilinear_upsample(x, scale_factor=None, size=None):
    """Mirrors BilinearUpsample.forward: `size` wins over `scale_factor`;
    list inputs are mapped element-wise (as in the PyTorch module)."""
    if isinstance(x, (list, tuple)):
        return [bilinear_upsample(xi, scale_factor=scale_factor, size=size) for xi in x]
    return _bilinear_upsample_impl(x, scale_factor=scale_factor, size=size)


def _reference_upsample(x, scale_factor=None, size=None):
    """Plain-JAX reference (same separable formulation, no Pallas)."""
    n, c, h_in, w_in = x.shape
    h_out, w_out, scale_h, scale_w = _output_geometry(h_in, w_in, scale_factor, size)
    a = _bilinear_matrix(h_out, h_in, scale_h)
    b = _bilinear_matrix(w_out, w_in, scale_w)
    return jnp.einsum("oh,nchw,pw->ncop", a, x, b)


if __name__ == "__main__":
    key = jax.random.PRNGKey(0)
    x = jax.random.normal(key, (2, 4, 16, 16), dtype=jnp.float32)

    # BilinearUpsample(scale_factor=2, mode='bilinear')(x)
    out = jax.block_until_ready(bilinear_upsample(x, scale_factor=2))
    assert out.shape == (2, 4, 32, 32), out.shape
    ref = _reference_upsample(x, scale_factor=2)
    assert jnp.allclose(out, ref, atol=1e-5, rtol=1e-5)

    # Dynamic `size` path from forward() (size overrides scale_factor).
    out_sized = jax.block_until_ready(bilinear_upsample(x, size=(24, 40)))
    assert out_sized.shape == (2, 4, 24, 40), out_sized.shape
    ref_sized = _reference_upsample(x, size=(24, 40))
    assert jnp.allclose(out_sized, ref_sized, atol=1e-5, rtol=1e-5)

    # List-input path from forward().
    outs = bilinear_upsample([x, x], scale_factor=2)
    outs = [jax.block_until_ready(o) for o in outs]
    assert all(o.shape == (2, 4, 32, 32) for o in outs)

    print("KERNEL_OK")
</pallas_src>

<mosaic_0001>
module attributes {stable_mosaic.version = 11 : i64} {
  func.func @_upsample_kernel(%arg0: i32, %arg1: i32, %arg2: memref<16x128xf32, #tpu.memory_space<vmem>>, %arg3: memref<32x16xf32, #tpu.memory_space<vmem>>, %arg4: memref<128x256xf32, #tpu.memory_space<vmem>>, %arg5: memref<32x256xf32, #tpu.memory_space<vmem>>) attributes {dimension_semantics = [#tpu.dimension_semantics<parallel>, #tpu.dimension_semantics<arbitrary>], iteration_bounds = array<i64: 1, 1>, scalar_prefetch = 0 : i64, scratch_operands = 0 : i64, tpu.core_type = #tpu.core_type<tc>, window_params = [{transform_indices = @transform_0, window_bounds = array<i64: 16, 128>}, {transform_indices = @transform_1, window_bounds = array<i64: 32, 16>}, {pipeline_mode = #tpu.pipeline_mode<synchronous>, transform_indices = @transform_2, window_bounds = array<i64: 128, 256>}, {transform_indices = @transform_3, window_bounds = array<i64: 32, 256>}]} {
    %c0 = arith.constant 0 : index
    %c0_0 = arith.constant 0 : index
    %0 = vector.load %arg3[%c0, %c0_0] : memref<32x16xf32, #tpu.memory_space<vmem>>, vector<32x16xf32>
    %c0_1 = arith.constant 0 : index
    %c0_2 = arith.constant 0 : index
    %1 = vector.load %arg2[%c0_1, %c0_2] : memref<16x128xf32, #tpu.memory_space<vmem>>, vector<16x128xf32>
    %cst = arith.constant dense<0.000000e+00> : vector<32x128xf32>
    %2 = tpu.matmul %0, %1, %cst {dimension_numbers = #tpu.dot_dimension_numbers<[1], [0], [0], [1], [0, 0, 1, 1], [], []>} : vector<32x16xf32>, vector<16x128xf32>, vector<32x128xf32> -> vector<32x128xf32>
    %c0_3 = arith.constant 0 : index
    %c0_4 = arith.constant 0 : index
    %3 = vector.load %arg4[%c0_3, %c0_4] : memref<128x256xf32, #tpu.memory_space<vmem>>, vector<128x256xf32>
    %cst_5 = arith.constant dense<0.000000e+00> : vector<32x256xf32>
    %4 = tpu.matmul %2, %3, %cst_5 {dimension_numbers = #tpu.dot_dimension_numbers<[1], [0], [0], [1], [0, 0, 1, 1], [], []>} : vector<32x128xf32>, vector<128x256xf32>, vector<32x256xf32> -> vector<32x256xf32>
    %c0_6 = arith.constant 0 : index
    %c0_7 = arith.constant 0 : index
    %5 = vector.load %arg5[%c0_6, %c0_7] : memref<32x256xf32, #tpu.memory_space<vmem>>, vector<32x256xf32>
    tpu.vector_store %arg5[%c0_6, %c0_7], %4 {strides = array<i32>} : memref<32x256xf32, #tpu.memory_space<vmem>>, vector<32x256xf32>,
    return
  }
  func.func @transform_0(%arg0: i32, %arg1: i32) -> (i32, i32) {
    %c0_i32 = arith.constant 0 : i32
    %c0_i32_0 = arith.constant 0 : i32
    return %c0_i32, %arg0 : i32, i32
  }
  func.func @transform_1(%arg0: i32, %arg1: i32) -> (i32, i32) {
    %c0_i32 = arith.constant 0 : i32
    %c0_i32_0 = arith.constant 0 : i32
    return %arg1, %c0_i32 : i32, i32
  }
  func.func @transform_2(%arg0: i32, %arg1: i32) -> (i32, i32) {
    %c0_i32 = arith.constant 0 : i32
    %c0_i32_0 = arith.constant 0 : i32
    %c0_i32_1 = arith.constant 0 : i32
    return %c0_i32, %c0_i32_0 : i32, i32
  }
  func.func @transform_3(%arg0: i32, %arg1: i32) -> (i32, i32) {
    %c0_i32 = arith.constant 0 : i32
    return %arg1, %arg0 : i32, i32
  }
}

</mosaic_0001>

<bundles_post_ra>
// kernel: _bilinear_upsample_impl.1
= control target key start
LH: loop header
LB: loop body
LE: loop exit
PB: predicated region body
PF: predicated region fallthrough
CT: control target
= control target key end

     0   :  { %vm20_vm0 = vcmask 130048   ;;  %v304_v38 = vmov 0.0   ;;  %s467_s0 = inlined_call_operand.vmem [shape: f32[16,128], index: 0, kind: input, shape index: {}]   ;;  %s468_s1 = inlined_call_operand.vmem [shape: f32[32,16], index: 1, kind: input, shape index: {}]   ;;  %s469_s2 = inlined_call_operand.vmem [shape: f32[128,256], index: 2, kind: input, shape index: {}]   ;;  %s470_s3 = inlined_call_operand.vmem [shape: f32[32,256], index: 3, kind: output, shape index: {}]  }
   0x1   :  { %v19_v0 = vld [vmem:[%s467_s0 + $0x8] sm:$0xff]  ;;  %v18_v1 = vld [vmem:[%s467_s0] sm:$0xff]  ;;  %v149_v4 = vld [vmem:[%s469_s2 + $0xf8] sm:$0xff]  ;;  %220 = vmatprep.mubr.f32.mxu1 %v304_v38 }
   0x2   :  { %v14_v2 = vld [vmem:[%s468_s1] sm:$0xff]  ;;  %261 = vmatprep.subr.mxu0 %v19_v0  ;;  %v15_v3 = vld [vmem:[%s468_s1 + $0x8] sm:$0xff]  ;;  %v148_v5 = vld [vmem:[%s469_s2 + $0xf0] sm:$0xff]  ;;  %271 = vmatprep.subr.mxu1 %v149_v4 }
   0x3   :  { %265 = vmatprep.mubr.msk.f32.mxu0 %vm20_vm0, %v14_v2  ;;  %262 = vmatpush3.msra.mxu0 %v19_v0  ;;  %v16_v6 = vld [vmem:[%s468_s1 + $0x10] sm:$0xff]  ;;  %v147_v7 = vld [vmem:[%s469_s2 + $0xe8] sm:$0xff]  ;;  %v146_v8 = vld [vmem:[%s469_s2 + $0xe0] sm:$0xff] }
   0x4   :  { %263 = vmatprep.subr.mxu0 %v18_v1  ;;  %287 = vmatpush1.msra.mxu1 %v148_v5  ;;  %v145_v9 = vld [vmem:[%s469_s2 + $0xd8] sm:$0xff]  ;;  %v144_v11 = vld [vmem:[%s469_s2 + $0xd0] sm:$0xff]  ;;  %v143_v12 = vld [vmem:[%s469_s2 + $0xc8] sm:$0xff] }
   0x5   :  { %264 = vmatpush3.msra.mxu0 %v18_v1  ;;  %v17_v10 = vld [vmem:[%s468_s1 + $0x18] sm:$0xff]  ;;  %272 = vmatprep.subr.mxu1 %v147_v7  ;;  %v142_v13 = vld [vmem:[%s469_s2 + $0xc0] sm:$0xff]  ;;  %v140_v15 = vld [vmem:[%s469_s2 + $0xb0] sm:$0xff] }
   0x6   :  { %266 = vmatmul.mubr.msk.f32.vlgmr.msra.gmra.mxu0 %vm20_vm0, %v15_v3  ;;  %150 = vmatprep.subr.mxu0 %v149_v4  ;;  %v141_v14 = vld [vmem:[%s469_s2 + $0xb8] sm:$0xff]  ;;  %v139_v16 = vld [vmem:[%s469_s2 + $0xa8] sm:$0xff]  ;;  %v138_v17 = vld [vmem:[%s469_s2 + $0xa0] sm:$0xff] }
   0x7   :  { %268 = vmatprep.mubr.msk.f32.mxu0 %vm20_vm0, %v16_v6  ;;  %151 = vmatpush1.msra.mxu0 %v148_v5  ;;  %v137_v18 = vld [vmem:[%s469_s2 + $0x98] sm:$0xff]  ;;  %v136_v19 = vld [vmem:[%s469_s2 + $0x90] sm:$0xff]  ;;  %v135_v20 = vld [vmem:[%s469_s2 + $0x88] sm:$0xff] }
   0x8   :  { %288 = vmatpush1.msra.mxu1 %v146_v8  ;;  %152 = vmatprep.subr.mxu0 %v147_v7  ;;  %v134_v21 = vld [vmem:[%s469_s2 + $0x80] sm:$0xff]  ;;  %v133_v22 = vld [vmem:[%s469_s2 + $0x78] sm:$0xff]  ;;  %v132_v23 = vld [vmem:[%s469_s2 + $0x70] sm:$0xff] }
   0x9   :  { %273 = vmatprep.subr.mxu1 %v145_v9  ;;  %153 = vmatpush1.msra.mxu0 %v146_v8  ;;  %v131_v24 = vld [vmem:[%s469_s2 + $0x68] sm:$0xff]  ;;  %v130_v25 = vld [vmem:[%s469_s2 + $0x60] sm:$0xff]  ;;  %v129_v26 = vld [vmem:[%s469_s2 + $0x58] sm:$0xff] }
   0xa   :  { %269 = vmatmul.mubr.msk.f32.gmra.mxu0 %vm20_vm0, %v17_v10  ;;  %289 = vmatpush1.msra.mxu1 %v144_v11  ;;  %v128_v27 = vld [vmem:[%s469_s2 + $0x50] sm:$0xff]  ;;  %v127_v28 = vld [vmem:[%s469_s2 + $0x48] sm:$0xff]  ;;  %v126_v29 = vld [vmem:[%s469_s2 + $0x40] sm:$0xff] }
   0xb   :  { %274 = vmatprep.subr.mxu1 %v143_v12  ;;  %154 = vmatprep.subr.mxu0 %v145_v9  ;;  %v125_v30 = vld [vmem:[%s469_s2 + $0x38] sm:$0xff]  ;;  %v124_v31 = vld [vmem:[%s469_s2 + $0x30] sm:$0xff]  ;;  %v123_v32 = vld [vmem:[%s469_s2 + $0x28] sm:$0xff] }
   0xc   :  { %290 = vmatpush1.msra.mxu1 %v142_v13  ;;  %155 = vmatpush1.msra.mxu0 %v144_v11  ;;  %v122_v33 = vld [vmem:[%s469_s2 + $0x20] sm:$0xff]  ;;  %v121_v34 = vld [vmem:[%s469_s2 + $0x18] sm:$0xff]  ;;  %v120_v35 = vld [vmem:[%s469_s2 + $0x10] sm:$0xff] }
   0xd   :  { %275 = vmatprep.subr.mxu1 %v141_v14  ;;  %156 = vmatprep.subr.mxu0 %v143_v12  ;;  %v119_v36 = vld [vmem:[%s469_s2 + $0x8] sm:$0xff]  ;;  %v118_v37 = vld [vmem:[%s469_s2] sm:$0xff] }
   0xe   :  { %291 = vmatpush1.msra.mxu1 %v140_v15  ;;  %157 = vmatpush1.msra.mxu0 %v142_v13 }
   0xf   :  { %276 = vmatprep.subr.mxu1 %v139_v16  ;;  %158 = vmatprep.subr.mxu0 %v141_v14 }
  0x10   :  { %292 = vmatpush1.msra.mxu1 %v138_v17  ;;  %159 = vmatpush1.msra.mxu0 %v140_v15 }
  0x11   :  { %277 = vmatprep.subr.mxu1 %v137_v18  ;;  %160 = vmatprep.subr.mxu0 %v139_v16 }
  0x12   :  { %293 = vmatpush1.msra.mxu1 %v136_v19  ;;  %161 = vmatpush1.msra.mxu0 %v138_v17 }
  0x13   :  { %278 = vmatprep.subr.mxu1 %v135_v20  ;;  %162 = vmatprep.subr.mxu0 %v137_v18 }
  0x14   :  { %294 = vmatpush1.msra.mxu1 %v134_v21  ;;  %163 = vmatpush1.msra.mxu0 %v136_v19 }
  0x15   :  { %279 = vmatprep.subr.mxu1 %v133_v22  ;;  %164 = vmatprep.subr.mxu0 %v135_v20 }
  0x16   :  { %295 = vmatpush1.msra.mxu1 %v132_v23  ;;  %165 = vmatpush1.msra.mxu0 %v134_v21 }
  0x17   :  { %280 = vmatprep.subr.mxu1 %v131_v24  ;;  %166 = vmatprep.subr.mxu0 %v133_v22 }
  0x18   :  { %296 = vmatpush1.msra.mxu1 %v130_v25  ;;  %167 = vmatpush1.msra.mxu0 %v132_v23 }
  0x19   :  { %281 = vmatprep.subr.mxu1 %v129_v26  ;;  %168 = vmatprep.subr.mxu0 %v131_v24 }
  0x1a   :  { %297 = vmatpush1.msra.mxu1 %v128_v27  ;;  %169 = vmatpush1.msra.mxu0 %v130_v25 }
  0x1b   :  { %282 = vmatprep.subr.mxu1 %v127_v28  ;;  %170 = vmatprep.subr.mxu0 %v129_v26 }
  0x1c   :  { %298 = vmatpush1.msra.mxu1 %v126_v29  ;;  %171 = vmatpush1.msra.mxu0 %v128_v27 }
  0x1d   :  { %283 = vmatprep.subr.mxu1 %v125_v30  ;;  %172 = vmatprep.subr.mxu0 %v127_v28 }
  0x1e   :  { %299 = vmatpush1.msra.mxu1 %v124_v31  ;;  %173 = vmatpush1.msra.mxu0 %v126_v29 }
  0x1f   :  { %284 = vmatprep.subr.mxu1 %v123_v32  ;;  %174 = vmatprep.subr.mxu0 %v125_v30 }
  0x20   :  { %300 = vmatpush1.msra.mxu1 %v122_v33  ;;  %175 = vmatpush1.msra.mxu0 %v124_v31 }
  0x21   :  { %285 = vmatprep.subr.mxu1 %v121_v34  ;;  %176 = vmatprep.subr.mxu0 %v123_v32 }
  0x22   :  { %301 = vmatpush1.msra.mxu1 %v120_v35  ;;  %177 = vmatpush1.msra.mxu0 %v122_v33 }
  0x23   :  { %286 = vmatprep.subr.mxu1 %v119_v36  ;;  %178 = vmatprep.subr.mxu0 %v121_v34 }
  0x24   :  { %179 = vmatpush1.msra.mxu0 %v120_v35  ;;  %302 = vmatpush1.msra.mxu1 %v118_v37 }
  0x25   :  { %180 = vmatprep.subr.mxu0 %v119_v36  ;;  %214 = vmatprep.mubr.f32.mxu0 %v304_v38 }
  0x26   :  { %181 = vmatpush1.msra.mxu0 %v118_v37 }
  0xc6   :  { %v267_v39 = vpop.f32.mrf.mxu0 }
  0xc7   :  { %221 = vmatmul.mubr.f32.vlgmr.msra.gmra.mxu1 %v267_v39 }
  0xc8   :  { %v99_v40 = vpop.f32.mrf.mxu0  ;;  %226 = vmatprep.mubr.f32.mxu1 %v304_v38 }
  0xc9   :  { %215 = vmatmul.mubr.f32.vlgmr.msra.gmra.mxu0 %v99_v40 }
  0xca   :  { %v270_v41 = vpop.f32.mrf.mxu0 }
  0xcc   :  { %v109_v42 = vpop.f32.mrf.mxu0 }
  0xcd   :  { %227 = vmatmul.mubr.f32.gmra.mxu1 %v109_v42 }
  0xce   :  { %232 = vmatprep.mubr.f32.mxu1 %v304_v38 }
  0xd1   :  { %233 = vmatmul.mubr.f32.gmra.mxu1 %v270_v41 }
 0x187   :  { %v222_v43 = vpop.f32.mrf.mxu1 }
 0x188   :  { %241 = vst [vmem:[%s470_s3 + $0x10] sm:$0xff] %v222_v43 }
 0x189   :  { %v216_v44 = vpop.f32.mrf.mxu0  ;;  %v224_v45 = vpop.f32.mrf.mxu1 }
 0x18a   :  { %239 = vst [vmem:[%s470_s3] sm:$0xff] %v216_v44  ;;  %242 = vst [vmem:[%s470_s3 + $0x18] sm:$0xff] %v224_v45 }
 0x18b   :  { %v218_v46 = vpop.f32.mrf.mxu0 }
 0x18c   :  { %240 = vst [vmem:[%s470_s3 + $0x8] sm:$0xff] %v218_v46 }
 0x18d   :  { %v228_v47 = vpop.f32.mrf.mxu1 }
 0x18e   :  { %243 = vst [vmem:[%s470_s3 + $0x20] sm:$0xff] %v228_v47 }
 0x18f   :  { %v230_v48 = vpop.f32.mrf.mxu1 }
 0x190   :  { %244 = vst [vmem:[%s470_s3 + $0x28] sm:$0xff] %v230_v48 }
 0x191   :  { %v234_v49 = vpop.f32.mrf.mxu1 }
 0x192   :  { %245 = vst [vmem:[%s470_s3 + $0x30] sm:$0xff] %v234_v49 }
 0x193   :  { %v236_v50 = vpop.f32.mrf.mxu1 }
 0x194   :  { %246 = vst [vmem:[%s470_s3 + $0x38] sm:$0xff] %v236_v50 }

</bundles_post_ra>
